<compile_context>
chip_gen: v7x
topology: tpu7x:2x2x1
jax: 0.10.0
libtpu: 0.0.40
codegen_flags: <defaults>
</compile_context>

<pallas_src>
import functools

import jax
import jax.numpy as jnp
from jax import lax
from jax.experimental import pallas as pl
from jax.experimental.pallas import tpu as pltpu

_NEG = -1e30        # large finite negative (avoids exp(-inf - -inf) NaNs)
_MINOR = 128        # lane width for m/l scratch (lane-dense stores)


def _vmem_limit_bytes():
    """Generation-aware scoped-VMEM limit with headroom below physical."""
    try:
        cap = getattr(pltpu.get_tpu_info(), "vmem_capacity_bytes", None)
        if cap:
            return int(min(cap * 3 // 4, 100 * 1024 * 1024))
    except Exception:
        pass
    return 64 * 1024 * 1024


def _pick_tile(n, target):
    """Largest tile <= target dividing n (multiple of 128), or full n if
    n <= target.  Returns 0 if n must be padded."""
    if n <= target:
        return n
    t = (target // 128) * 128
    while t >= 128:
        if n % t == 0:
            return t
        t -= 128
    return 0


# --------------------------------------------------------------------------
# Kernel 1: packed QKV projection.  One matmul per (batch, n-tile, seq-tile).
# Weight is [H, 3H] (already transposed, scale folded into the Q part).
# --------------------------------------------------------------------------
def _qkv_proj_kernel(x_ref, w_ref, b_ref, qkv_ref):
    x = x_ref[...]                                           # [tp, H]
    y = jnp.dot(x, w_ref[...], preferred_element_type=jnp.float32) + b_ref[...]
    qkv_ref[...] = y.astype(qkv_ref.dtype)                   # [tp, tn]


# --------------------------------------------------------------------------
# Kernel 2: flash-style causal attention, grid = (B, nH, q-block, kv-block).
# Output block is resident across the kv axis; finalized on the last kv step.
# --------------------------------------------------------------------------
def _flash_attn_kernel(q_ref, k_ref, v_ref, mask_ref, o_ref,
                       m_sc, l_sc, acc_sc, *, tq, tk):
    qi = pl.program_id(2)
    ki = pl.program_id(3)
    nk = pl.num_programs(3)

    @pl.when(ki == 0)
    def _init():
        m_sc[...] = jnp.full_like(m_sc, _NEG)
        l_sc[...] = jnp.zeros_like(l_sc)
        acc_sc[...] = jnp.zeros_like(acc_sc)

    # Causal block skip: this kv tile contributes only if its first key index
    # is <= the last query index of this q tile (K/V index_map is clamped to
    # the same frontier block, so skipped steps also issue no DMA).
    @pl.when(ki * tk <= qi * tq + (tq - 1))
    def _compute():
        q = q_ref[...]                                        # [tq, d]
        k = k_ref[...]                                        # [tk, d]
        v = v_ref[...]                                        # [tk, d]
        amask = mask_ref[...].astype(jnp.float32)             # [1, tk]

        # One additive bias per tile: causal mask + attention mask combined.
        row = lax.broadcasted_iota(jnp.int32, (tq, tk), 0) + qi * tq
        col = lax.broadcasted_iota(jnp.int32, (tq, tk), 1) + ki * tk
        bias = jnp.where(col <= row, amask, _NEG)             # [tq, tk]

        # q @ k^T (contract head dim of both operands; no transposed copy).
        s = lax.dot_general(q, k, (((1,), (1,)), ((), ())),
                            preferred_element_type=jnp.float32)   # [tq, tk]
        s = s + bias

        m_prev = m_sc[:, 0:1]                                  # [tq, 1]
        l_prev = l_sc[:, 0:1]                                  # [tq, 1]
        m_next = jnp.maximum(m_prev, jnp.max(s, axis=-1, keepdims=True))
        alpha = jnp.exp(m_prev - m_next)                       # [tq, 1]
        p = jnp.exp(s - m_next)                                # [tq, tk] f32
        l_next = alpha * l_prev + jnp.sum(p, axis=-1, keepdims=True)

        pv = jnp.dot(p.astype(v.dtype), v,
                     preferred_element_type=jnp.float32)       # [tq, d]
        acc_sc[...] = alpha * acc_sc[...] + pv                 # whole-scratch store

        # Lane-dense (unmasked) scratch stores.
        m_sc[...] = jnp.broadcast_to(m_next, (tq, _MINOR))
        l_sc[...] = jnp.broadcast_to(l_next, (tq, _MINOR))

    @pl.when(ki == nk - 1)
    def _finalize():
        l = l_sc[:, 0:1]
        inv = pl.reciprocal(l, approx=True)
        inv = inv * (2.0 - l * inv)          # one Newton step -> ~f32 accuracy
        o_ref[...] = (acc_sc[...] * inv).astype(o_ref.dtype)


def causal_self_attention(hidden_states, attention_mask, params, num_heads):
    """hidden_states: [B, T, H], attention_mask: [B, 1, 1, T] -> [B, T, H]"""
    B, T, H = hidden_states.shape
    nH = num_heads
    d = H // nH
    dtype = hidden_states.dtype
    vmem = _vmem_limit_bytes()

    # --- one-time wrapper-side prep ------------------------------------------
    scale = 1.0 / (float(d) ** 0.5)
    # PyTorch nn.Linear weights are [out, in]; transpose, pack, fold scale in.
    w_cat = jnp.concatenate(
        [(params['wq'] * scale).T, params['wk'].T, params['wv'].T],
        axis=1).astype(dtype)                                   # [H, 3H]
    b_cat = jnp.concatenate(
        [params['bq'] * scale, params['bk'], params['bv']]
    ).reshape(1, 3 * H).astype(jnp.float32)                     # [1, 3H]

    # --- sequence tiling (pad if T has no suitable divisor) ------------------
    seq_target = 256        # safe on v5e/v7x; v6e can sweep up to 512
    tile = _pick_tile(T, seq_target)
    if tile == 0:
        T_pad = -(-T // seq_target) * seq_target
        tile = seq_target
    else:
        T_pad = T
    if T_pad != T:
        hidden_states = jnp.pad(hidden_states,
                                ((0, 0), (0, T_pad - T), (0, 0)))
        attention_mask = jnp.pad(attention_mask,
                                 ((0, 0), (0, 0), (0, 0), (0, T_pad - T)))
    tp = tile   # projection seq tile
    tq = tile   # attention query tile
    tk = tile   # attention key/value tile

    tn = _pick_tile(3 * H, 512)      # weight output-dim tile (VMEM safety)
    if tn == 0:
        tn = 3 * H

    # --- kernel 1: packed QKV projection -------------------------------------
    qkv = pl.pallas_call(
        _qkv_proj_kernel,
        out_shape=jax.ShapeDtypeStruct((B, T_pad, 3 * H), dtype),
        grid_spec=pltpu.PrefetchScalarGridSpec(
            num_scalar_prefetch=0,
            grid=(B, 3 * H // tn, T_pad // tp),
            in_specs=[
                pl.BlockSpec((None, tp, H), lambda b, ni, ti: (b, ti, 0)),  # x
                pl.BlockSpec((H, tn), lambda b, ni, ti: (0, ni)),           # W
                pl.BlockSpec((1, tn), lambda b, ni, ti: (0, ni)),           # bias
            ],
            out_specs=pl.BlockSpec((None, tp, tn),
                                   lambda b, ni, ti: (b, ti, ni)),
        ),
        compiler_params=pltpu.CompilerParams(
            dimension_semantics=("parallel", "parallel", "parallel"),
            vmem_limit_bytes=vmem),
    )(hidden_states, w_cat, b_cat)

    # Split heads: [B, T, 3H] -> q/k/v each [B, nH, T, d] (canonical flash layout).
    qkvh = jnp.transpose(qkv.reshape(B, T_pad, 3, nH, d), (2, 0, 3, 1, 4))
    q, k, v = qkvh[0], qkvh[1], qkvh[2]

    # --- kernel 2: flash-style causal attention -------------------------------
    def kv_block(qi, ki):
        # Clamp above-diagonal kv blocks to the causal frontier: same block
        # index as the previous step -> no new DMA for skipped tiles.
        return jnp.minimum(ki, (qi * tq + tq - 1) // tk)

    attn_kernel = functools.partial(_flash_attn_kernel, tq=tq, tk=tk)
    out = pl.pallas_call(
        attn_kernel,
        out_shape=jax.ShapeDtypeStruct((B, nH, T_pad, d), dtype),
        grid_spec=pltpu.PrefetchScalarGridSpec(
            num_scalar_prefetch=0,
            grid=(B, nH, T_pad // tq, T_pad // tk),
            in_specs=[
                pl.BlockSpec((None, None, tq, d),
                             lambda b, h, qi, ki: (b, h, qi, 0)),           # q
                pl.BlockSpec((None, None, tk, d),
                             lambda b, h, qi, ki: (b, h, kv_block(qi, ki), 0)),  # k
                pl.BlockSpec((None, None, tk, d),
                             lambda b, h, qi, ki: (b, h, kv_block(qi, ki), 0)),  # v
                pl.BlockSpec((None, None, 1, tk),
                             lambda b, h, qi, ki: (b, 0, 0, ki)),           # mask
            ],
            out_specs=pl.BlockSpec((None, None, tq, d),
                                   lambda b, h, qi, ki: (b, h, qi, 0)),
            scratch_shapes=[
                pltpu.VMEM((tq, _MINOR), jnp.float32),   # running max m
                pltpu.VMEM((tq, _MINOR), jnp.float32),   # running sum l
                pltpu.VMEM((tq, d), jnp.float32),        # f32 accumulator
            ],
        ),
        compiler_params=pltpu.CompilerParams(
            dimension_semantics=("parallel", "parallel", "parallel", "arbitrary"),
            vmem_limit_bytes=vmem),
    )(q, k, v, attention_mask)

    y = jnp.transpose(out, (0, 2, 1, 3)).reshape(B, T_pad, H)
    return y[:, :T] if T_pad != T else y


def _reference(hidden_states, attention_mask, params, num_heads):
    """Pure-JAX reference mirroring the PyTorch forward, for validation."""
    B, T, H = hidden_states.shape
    d = H // num_heads

    def proj(w, b):
        p = hidden_states @ w.T + b
        return p.reshape(B, T, num_heads, d).transpose(0, 2, 1, 3)  # [B, nH, T, d]

    q = proj(params['wq'], params['bq'])
    k = proj(params['wk'], params['bk'])
    v = proj(params['wv'], params['bv'])

    scores = jnp.einsum('bhtd,bhsd->bhts', q, k / (d ** 0.5))
    causal = jnp.tril(jnp.ones((T, T)))
    scores = jnp.where(causal == 0, float('-inf'), scores)
    scores = scores + attention_mask
    probs = jax.nn.softmax(scores, axis=-1)
    y = jnp.einsum('bhts,bhsd->bhtd', probs, v)
    return y.transpose(0, 2, 1, 3).reshape(B, T, H)


if __name__ == "__main__":
    # config: hidden_size=32, num_attention_heads=4 -> head_size=8
    B, T, H, NH = 2, 8, 32, 4

    key = jax.random.PRNGKey(0)
    ks = jax.random.split(key, 8)

    def linear_init(kw, kb, fan_in, fan_out):
        bound = 1.0 / (fan_in ** 0.5)
        w = jax.random.uniform(kw, (fan_out, fan_in), jnp.float32, -bound, bound)
        b = jax.random.uniform(kb, (fan_out,), jnp.float32, -bound, bound)
        return w, b

    wq, bq = linear_init(ks[0], ks[1], H, H)
    wk, bk = linear_init(ks[2], ks[3], H, H)
    wv, bv = linear_init(ks[4], ks[5], H, H)
    params = dict(wq=wq, bq=bq, wk=wk, bk=bk, wv=wv, bv=bv)

    hidden_states = jax.random.normal(ks[6], (B, T, H), jnp.float32)
    # additive attention mask: 0 for keep, large negative for masked-out keys
    keep = (jax.random.uniform(ks[7], (B, T)) > 0.1).astype(jnp.float32)
    keep = keep.at[:, 0].set(1.0)  # ensure at least the first key is attendable
    attention_mask = ((1.0 - keep) * -10000.0).reshape(B, 1, 1, T)

    out = causal_self_attention(hidden_states, attention_mask, params, NH)
    out = jax.block_until_ready(out)

    ref = _reference(hidden_states, attention_mask, params, NH)
    assert out.shape == (B, T, H)
    assert jnp.allclose(out, ref, atol=2e-4, rtol=2e-4), "mismatch vs reference"

    print("KERNEL_OK")
</pallas_src>

<mosaic_0001>
module attributes {stable_mosaic.version = 11 : i64} {
  func.func @_qkv_proj_kernel(%arg0: i32, %arg1: i32, %arg2: i32, %arg3: memref<1x8x32xf32, #tpu.memory_space<vmem>>, %arg4: memref<32x96xf32, #tpu.memory_space<vmem>>, %arg5: memref<1x96xf32, #tpu.memory_space<vmem>>, %arg6: memref<1x8x96xf32, #tpu.memory_space<vmem>>) attributes {dimension_semantics = [#tpu.dimension_semantics<parallel>, #tpu.dimension_semantics<parallel>, #tpu.dimension_semantics<parallel>], iteration_bounds = array<i64: 2, 1, 1>, scalar_prefetch = 0 : i64, scratch_operands = 0 : i64, tpu.core_type = #tpu.core_type<tc>, window_params = [{transform_indices = @transform_0, window_bounds = array<i64: 1, 8, 32>}, {transform_indices = @transform_1, window_bounds = array<i64: 32, 96>}, {transform_indices = @transform_2, window_bounds = array<i64: 1, 96>}, {transform_indices = @transform_3, window_bounds = array<i64: 1, 8, 96>}]} {
    %c0 = arith.constant 0 : index
    %c0_0 = arith.constant 0 : index
    %c0_1 = arith.constant 0 : index
    %0 = vector.load %arg3[%c0, %c0_0, %c0_1] : memref<1x8x32xf32, #tpu.memory_space<vmem>>, vector<1x8x32xf32>
    %1 = vector.shape_cast %0 : vector<1x8x32xf32> to vector<8x32xf32>
    %c0_2 = arith.constant 0 : index
    %c0_3 = arith.constant 0 : index
    %2 = vector.load %arg4[%c0_2, %c0_3] : memref<32x96xf32, #tpu.memory_space<vmem>>, vector<32x96xf32>
    %cst = arith.constant dense<0.000000e+00> : vector<8x96xf32>
    %3 = tpu.matmul %1, %2, %cst {dimension_numbers = #tpu.dot_dimension_numbers<[1], [0], [0], [1], [0, 0, 1, 1], [], []>} : vector<8x32xf32>, vector<32x96xf32>, vector<8x96xf32> -> vector<8x96xf32>
    %c0_4 = arith.constant 0 : index
    %c0_5 = arith.constant 0 : index
    %4 = vector.load %arg5[%c0_4, %c0_5] : memref<1x96xf32, #tpu.memory_space<vmem>>, vector<1x96xf32>
    %5 = vector.broadcast %4 : vector<1x96xf32> to vector<8x96xf32>
    %6 = arith.addf %3, %5 : vector<8x96xf32>
    %c0_6 = arith.constant 0 : index
    %c0_7 = arith.constant 0 : index
    %c0_8 = arith.constant 0 : index
    %7 = vector.load %arg6[%c0_6, %c0_7, %c0_8] : memref<1x8x96xf32, #tpu.memory_space<vmem>>, vector<1x8x96xf32>
    %8 = vector.shape_cast %7 : vector<1x8x96xf32> to vector<8x96xf32>
    %9 = vector.shape_cast %6 : vector<8x96xf32> to vector<1x8x96xf32>
    tpu.vector_store %arg6[%c0_6, %c0_7, %c0_8], %9 {strides = array<i32>} : memref<1x8x96xf32, #tpu.memory_space<vmem>>, vector<1x8x96xf32>,
    return
  }
  func.func @transform_0(%arg0: i32, %arg1: i32, %arg2: i32) -> (i32, i32, i32) {
    %c0_i32 = arith.constant 0 : i32
    %c0_i32_0 = arith.constant 0 : i32
    return %arg0, %arg2, %c0_i32 : i32, i32, i32
  }
  func.func @transform_1(%arg0: i32, %arg1: i32, %arg2: i32) -> (i32, i32) {
    %c0_i32 = arith.constant 0 : i32
    %c0_i32_0 = arith.constant 0 : i32
    return %c0_i32, %arg1 : i32, i32
  }
  func.func @transform_2(%arg0: i32, %arg1: i32, %arg2: i32) -> (i32, i32) {
    %c0_i32 = arith.constant 0 : i32
    %c0_i32_0 = arith.constant 0 : i32
    return %c0_i32, %arg1 : i32, i32
  }
  func.func @transform_3(%arg0: i32, %arg1: i32, %arg2: i32) -> (i32, i32, i32) {
    %c0_i32 = arith.constant 0 : i32
    return %arg0, %arg2, %arg1 : i32, i32, i32
  }
}

</mosaic_0001>

<bundles_post_ra>
// kernel: tpu_custom_call.1
= control target key start
LH: loop header
LB: loop body
LE: loop exit
PB: predicated region body
PF: predicated region fallthrough
CT: control target
= control target key end

     0   :  { %8 = vsyncpa [#allocation3], 0  ;;  %s1047_s0 = inlined_call_operand.hbm [shape: f32[2,8,32], index: 0, kind: input, shape index: {}]   ;;  %s1048_s1 = inlined_call_operand.hbm [shape: f32[32,96], index: 1, kind: input, shape index: {}]   ;;  %s1049_s2 = inlined_call_operand.hbm [shape: f32[1,96], index: 2, kind: input, shape index: {}]   ;;  %s1050_s3 = inlined_call_operand.hbm [shape: f32[2,8,96], index: 3, kind: output, shape index: {}]  }
   0x1   :  { %10 = vsyncpa [#allocation3 + $0x1], 0 }
   0x2   :  { %11 = vsyncpa [#allocation6], 0 }
   0x3   :  { %12 = vsyncpa [#allocation4], 0 }
   0x4   :  { %14 = vsyncpa [#allocation4 + $0x1], 0  ;;  %s796_s12 = smov 0   ;;  %s798_s13 = smov 0  }
   0x5   :  { %s800_s14 = smov 0   ;;  %s802_s15 = smov 0  }
   0x6   :  { %s804_s16 = smov 0   ;;  %s806_s17 = smov 0  }
   0x7 LB: > { %s464_s18 = sadd.s32 4294967295, %s765_s17   ;;  %s465_s19 = sadd.s32 4294967294, %s765_s17   ;;  %s765_s17 = sphi %s806_s17, %s20_s17   ;;  %s761_s16 = sphi %s804_s16, %s1072_s16   ;;  %s757_s15 = sphi %s802_s15, %s1071_s15   ;;  %s753_s14 = sphi %s800_s14, %s1070_s14   ;;  %s749_s13 = sphi %s798_s13, %s1069_s13   ;;  %s745_s12 = sphi %s796_s12, %s1068_s12  }
   0x8   : > { %p61_p0 = scmp.ne.s32.totalorder %s749_s13, %s745_s12  ;;  %p830_p1 = scmp.eq.s32.totalorder %s464_s18, 0 }
   0x9   : > { %p834_p2 = scmp.eq.s32.totalorder %s464_s18, 1  ;;  %p147_p3 = scmp.eq.s32.totalorder %s465_s19, 1 }
   0xa   : > { %s1055_s20 = scalar_select %p830_p1, 1, 0 }
   0xb   : > { %p840_p4 = por %p830_p1, %p61_p0  ;;  %p466_p5 = scmp.ge.s32.totalorder %s765_s17, 1 }
   0xc   : > { %p845_p6 = por %p147_p3, %p61_p0  ;;  %p154_p7 = scmp.lt.s32.totalorder %s765_s17, 3 }
   0xd   : > { %s1057_s22 = scalar_select %p840_p4, 1, 0 }
   0xe   : > { %s1058_s23 = scalar_select %p845_p6, 1, 0 }
   0xf   : > { %p850_p8 = pnand %p466_p5, %p154_p7  ;;  %s767_s25 = smov [#allocation5]  }
  0x10   : > { %s168_s26 = sshll.u32 %s767_s25, 4  ;;  %s768_s28 = smov [#allocation7]   ;;  %s854_s26 = int_to_ptr.vmem [resolvable:$true] %s168_s26 }
  0x11   : > { %p517_p9 = pneg %p850_p8  ;;  %s184_s29 = sshll.u32 %s768_s28, 4  ;;  %s865_s29 = int_to_ptr.vmem [resolvable:$true] %s184_s29 }
  0x12   : > { %s593_s5 = scalar_lea.hbm %s1048_s1, 512 }
  0x13   : > { %p861_p11 = pnand %p517_p9, %p830_p1  ;;  %p594_p12 = scmp.ne.s32.totalorder %s1048_s1, %s593_s5 }
  0x14   : > { %p600_p5 = scmp.lt.u32.totalorder %s593_s5, %s1048_s1 }
  0x15   : > { %p595_p13 = pneg %p861_p11 }
  0x17   : > { %p596_p0 = pnand %p595_p13, %p594_p12 }
  0x19   : > { %p597_p3 = pneg %p596_p0 }
  0x1b   : > { %p602_p7 = pnand %p600_p5, %p597_p3 }
  0x1d   : > { %605 = shalt.err (!%p602_p7)
}
  0x1e   : > { %s606_s10 = scalar_lea.vmem %s854_s26, 512  ;;  %p614_p1 = scmp.lt.s32.totalorder %s854_s26, %s854_s26 }
  0x1f   : > { %p607_p9 = scmp.ne.s32.totalorder %s854_s26, %s606_s10  ;;  %p615_p12 = scmp.lt.s32.totalorder %s606_s10, %s606_s10 }
  0x21   : > { %p609_p10 = pnand %p607_p9, %p595_p13  ;;  %p616_p0 = por %p615_p12, %p614_p1 }
  0x23   : > { %p610_p6 = pneg %p609_p10 }
  0x25   : > { %p617_p4 = pnand %p616_p0, %p610_p6 }
  0x27   : > { %620 = shalt.err (!%p617_p4)
}
  0x28   : > { %s769_s11 = smov 128   ;;  %s770_s18 = smov 8  }
  0x29   : > { %520 = dma.hbm_to_vmem [thread:$0]  (!%p861_p11), %s1048_s1, 512, %s854_s26, [#allocation6], %s769_s11, %s769_s11, %s770_s18  }
  0x2a   : > { %s621_s4 = scalar_lea.hbm %s1049_s2, 16 }
  0x2b   : > { %p622_p1 = scmp.ne.s32.totalorder %s1049_s2, %s621_s4  ;;  %p628_p10 = scmp.lt.u32.totalorder %s621_s4, %s1049_s2 }
  0x2d   : > { %p624_p4 = pnand %p622_p1, %p595_p13 }
  0x2f   : > { %p625_p6 = pneg %p624_p4 }
  0x31   : > { %p630_p3 = pnand %p628_p10, %p625_p6 }
  0x33   : > { %633 = shalt.err (!%p630_p3)
}
  0x34   : > { %s634_s26 = scalar_lea.vmem %s865_s29, 16  ;;  %s641_s9 = scalar_lea.vmem %s865_s29, 32 }
  0x35   : > { %p635_p5 = scmp.ne.s32.totalorder %s865_s29, %s634_s26  ;;  %p642_p12 = scmp.lt.s32.totalorder %s865_s29, %s865_s29 }
  0x36   : > { %p643_p0 = scmp.lt.s32.totalorder %s641_s9, %s634_s26 }
  0x37   : > { %p637_p7 = pnand %p635_p5, %p595_p13 }
  0x38   : > { %p644_p1 = por %p643_p0, %p642_p12 }
  0x39   : > { %p638_p9 = pneg %p637_p7 }
  0x3b   : > { %p645_p4 = pnand %p644_p1, %p638_p9 }
  0x3d   : > { %648 = shalt.err (!%p645_p4)
}
  0x3e   : > { %523 = dma.hbm_to_vmem [thread:$0]  (!%p861_p11), %s1049_s2, 16, %s865_s29, [#allocation6]  }
  0x3f   : > { %s39_s18 = sadd.s32 1, %s761_s16  ;;  %s48_s19 = sadd.s32 1, %s753_s14 }
  0x40   : > { %p41_p13 = scmp.ge.s32.totalorder %s39_s18, 2  ;;  %p55_p6 = scmp.ne.s32.totalorder %s753_s14, %s749_s13 }
  0x41   : > { %p56_p10 = scmp.eq.s32.totalorder %s765_s17, 0  ;;  %p534_p3 = scmp.lt.s32.totalorder %s765_s17, 2 }
  0x42   : > { %s1074_s18 = smov (%p41_p13, %s39_s18), 0  ;;  %p930_p7 = por %p834_p2, %p55_p6 }
  0x43   : > { %p57_p5 = por %p56_p10, %p55_p6  ;;  %s43_s25 = ssub.s32 %s761_s16, %s1074_s18 }
  0x44   : > { %s1061_s27 = scalar_select %p930_p7, 1, 0 }
  0x45   : > { %s195_s28 = sand.u32 1, %s753_s14   ;;  %p46_p9 = scmp.eq.s32.totalorder %s43_s25, 0 }
  0x46   : > { %s470_s29 = sshll.u32 %s195_s28, 3  ;;  %s471_s30 = sshll.u32 %s761_s16, 7 }
  0x47   : > { %s939_s4 = scalar_select %p46_p9, %s753_s14, %s48_s19  }
  0x48   : > { %s944_s7 = scalar_lea.hbm %s1047_s0, %s471_s30  ;;  %s199_s21 = scalar_lea.vmem [#allocation2], %s470_s29 }
  0x49   : > { %s207_s8 = sshll.u32 %s199_s21, 4  ;;  %p948_p2 = pnand %p534_p3, %p57_p5  ;;  %s952_s8 = int_to_ptr.vmem [resolvable:$true] %s207_s8 }
  0x4a   : > { %s196_s9 = scalar_lea.sflag [#allocation3], %s195_s28  ;;  %s649_s10 = scalar_lea.hbm %s944_s7, 128 }
  0x4b   : > { %p650_p11 = scmp.ne.s32.totalorder %s944_s7, %s649_s10  ;;  %p651_p12 = pneg %p948_p2 }
  0x4c   : > { %s654_s25 = scalar_lea.hbm %s1047_s0, 256  ;;  %p655_p4 = scmp.lt.u32.totalorder %s944_s7, %s1047_s0 }
  0x4d   : > { %p652_p0 = pnand %p651_p12, %p650_p11  ;;  %p656_p13 = scmp.lt.u32.totalorder %s654_s25, %s649_s10 }
  0x4e   : > { %p658_p10 = scmp.lt.u32.totalorder %s649_s10, %s944_s7 }
  0x4f   : > { %p653_p1 = pneg %p652_p0  ;;  %p657_p6 = por %p656_p13, %p655_p4 }
  0x51   : > { %p659_p3 = por %p658_p10, %p657_p6 }
  0x53   : > { %p660_p5 = pnand %p659_p3, %p653_p1 }
  0x55   : > { %663 = shalt.err (!%p660_p5)
}
  0x56   : > { %s664_s28 = scalar_lea.vmem %s952_s8, 128  ;;  %s771_s5 = smov [#allocation2]  }
  0x57   : > { %p665_p9 = scmp.ne.s32.totalorder %s952_s8, %s664_s28  ;;  %s669_s6 = sshll.u32 %s771_s5, 4  ;;  %s670_s6 = int_to_ptr.vmem [resolvable:$false] %s669_s6 }
  0x58   : > { %s671_s21 = scalar_lea.vmem %s670_s6, 256  ;;  %p672_p7 = scmp.lt.s32.totalorder %s952_s8, %s670_s6 }
  0x59   : > { %p667_p11 = pnand %p665_p9, %p651_p12  ;;  %p673_p4 = scmp.lt.s32.totalorder %s671_s21, %s664_s28 }
  0x5b   : > { %p668_p0 = pneg %p667_p11  ;;  %p674_p13 = por %p673_p4, %p672_p7 }
  0x5d   : > { %p675_p6 = pnand %p674_p13, %p668_p0 }
  0x5f   : > { %678 = shalt.err (!%p675_p6)
}
  0x60   : > { %527 = dma.hbm_to_vmem [thread:$0]  (!%p948_p2), %s944_s7, 128, %s952_s8, %s196_s9  }
  0x61   : > { %216 = sbr.rel (%p850_p8) target bundleno = 347 (0x15b), region = 32  ;;  %s982_s10 = sand.u32 (!%p850_p8), 1, %s749_s13  }
  0x62   : > { %s473_s11 = sshll.u32 (!%p850_p8), %s982_s10, 3  ;;  %s219_s19 = scalar_lea.sflag (!%p850_p8), [#allocation3], %s982_s10 }
  0x63   : > { %s222_s25 = scalar_lea.vmem (!%p850_p8), [#allocation2], %s473_s11  ;;  %p1063_p7 = scmp.ne.s32.totalorder (!%p850_p8), %s1057_s22, 0 }
  0x68   : > { %732 = dma.done.wait (%p1063_p7), %s219_s19, 128  }
  0x69   : > { %734 = vsyncadd (%p1063_p7), %s219_s19, 4294967168  ;;  %p1064_p12 = scmp.ne.s32.totalorder %s1055_s20, 0 }
  0x6b   : > { %736 = dma.done.wait (%p1064_p12), [#allocation6], 528  }
  0x6c   : > { %738 = vsyncadd (%p1064_p12), [#allocation6], 4294966768  ;;  %v772_v0 = vmov 0.0|0.0   ;;  %vm773_vm0 = vmmov 0   ;;  %v774_v1 = vmov 0.0   ;;  %v254_v2 = vld [vmem:[#allocation5] sm:$0xff] }
  0x6d   : > { %499 = vmatprep.subr.bf16.mxu0 %v772_v0  ;;  %496 = vmatprep.mubr.msk.f32.mxu0 %vm773_vm0, %v774_v1  ;;  %v255_v3 = vld [vmem:[#allocation5 + $0x8] sm:$0xff]  ;;  %v256_v4 = vld [vmem:[#allocation5 + $0x10] sm:$0xff]  ;;  %v257_v6 = vld [vmem:[#allocation5 + $0x18] sm:$0xff]  ;;  %vm265_vm1 = vcmask 261120   ;;  %s480_s20 = sshll.u32 %s757_s15, 7  ;;  %s252_s22 = scalar_lea.vmem [#allocation8], %s473_s11 }
  0x6e   : > { %v500_v5 = vpack.c.bf16 %v255_v3, %v254_v2  ;;  %v503_v7 = vpack.c.bf16 %v257_v6, %v256_v4  ;;  %v253_v8 = vld [vmem:[%s222_s25] sm:$0xff]  ;;  %v477_v9 = vld [vmem:[#allocation7] ss:$0 sm:$0xff]  ;;  %s357_s24 = sshll.u32 %s252_s22, 4  ;;  %vm339_vm2 = vcmask 785408   ;;  %s998_s26 = scalar_lea.hbm %s1050_s3, %s480_s20  ;;  %s1000_s24 = int_to_ptr.vmem [resolvable:$true] %s357_s24 }
  0x6f   : > { %s342_s9 = scalar_lea.sflag [#allocation4], %s982_s10  ;;  %s679_s29 = scalar_lea.vmem %s1000_s24, 128 }
  0x70   : > { %501 = vmatpush3.bf16.msra.mxu0 %v500_v5  ;;  %p680_p8 = scmp.ne.s32.totalorder %s1000_s24, %s679_s29  ;;  %p1065_p2 = scmp.ne.s32.totalorder %s1061_s27, 0 }
  0x71   : > { %502 = vmatprep.subr.bf16.mxu0 %v772_v0  ;;  %s775_s15 = smov [#allocation8]  }
  0x72   : > { %p681_p1 = pnand %p680_p8, %p1065_p2  ;;  %s683_s30 = sshll.u32 %s775_s15, 4  ;;  %s684_s30 = int_to_ptr.vmem [resolvable:$false] %s683_s30 }
  0x73   : > { %s685_s28 = scalar_lea.vmem %s684_s30, 256  ;;  %p686_p3 = scmp.lt.s32.totalorder %s1000_s24, %s684_s30 }
  0x74   : > { %504 = vmatpush3.bf16.msra.mxu0 %v503_v7  ;;  %p682_p10 = pneg %p681_p1  ;;  %p687_p5 = scmp.lt.s32.totalorder %s685_s28, %s679_s29 }
  0x76   : > { %p688_p9 = por %p687_p5, %p686_p3 }
  0x77   : > { %497 = vmatmul.mubr.msk.f32.vlgmr.msra.gmra.mrb[0].mxu0 %vm265_vm1, %v253_v8 }
  0x78   : > { %p689_p11 = pnand %p688_p9, %p682_p10 }
 0x14a   : > { %v335_v10 = vpop.f32.mrb[0].mxu0 }
 0x14b   : > { %v336_v11 = vadd.f32 %v477_v9, %v335_v10  ;;  %v498_v12 = vpop.f32.mrb[1].mxu0 }
 0x14d   : > { %340 = vst.msk [vmem:[%s252_s22] sm:$0xff] %vm339_vm2, %v336_v11 }
 0x14e   : > { %692 = shalt.err (!%p689_p11)
}
 0x14f   : > { %s693_s5 = scalar_lea.hbm %s998_s26, 128  ;;  %s697_s10 = scalar_lea.hbm %s1050_s3, 256 }
 0x150   : > { %p694_p0 = scmp.ne.s32.totalorder %s998_s26, %s693_s5  ;;  %p698_p6 = scmp.lt.u32.totalorder %s998_s26, %s1050_s3 }
 0x151   : > { %p699_p7 = scmp.lt.u32.totalorder %s697_s10, %s693_s5  ;;  %p701_p8 = scmp.lt.u32.totalorder %s693_s5, %s998_s26 }
 0x152   : > { %p695_p4 = pnand %p694_p0, %p1065_p2 }
 0x153   : > { %p700_p12 = por %p699_p7, %p698_p6 }
 0x154   : > { %p696_p13 = pneg %p695_p4 }
 0x155   : > { %p702_p1 = por %p701_p8, %p700_p12 }
 0x157   : > { %p703_p10 = pnand %p702_p1, %p696_p13 }
 0x159   : > { %706 = shalt.err (!%p703_p10)
}
 0x15a   : > { %515 = dma.vmem_to_hbm [thread:$0]  (%p1065_p2), %s1000_s24, 128, %s998_s26, %s342_s9  }
 0x15b PF: > { %s369_s25 = sand.u32 1, %s745_s12   ;;  %p1066_p3 = scmp.ne.s32.totalorder %s1058_s23, 0 }
 0x15c   : > { %p1067_p5 = scmp.ge.s32.totalorder %s765_s17, 2  ;;  %s370_s20 = scalar_lea.sflag [#allocation4], %s369_s25 }
 0x15e   : > { %p529_p9 = pnand %p1067_p5, %p1066_p3 }
 0x160   : > { %740 = dma.done.wait (!%p529_p9), %s370_s20, 128  }
 0x161   : > { %742 = vsyncadd (!%p529_p9), %s370_s20, 4294967168  ;;  %s20_s17 = sadd.s32 1, %s765_s17   ;;  %s1068_s12 = smov %s749_s13 }
 0x162   : > { %p17_p11 = scmp.ge.s32.totalorder %s20_s17, 4   ;;  %s1069_s13 = smov %s753_s14 }
 0x163   : > { %s1070_s14 = smov %s939_s4  ;;  %s1071_s15 = smov %s761_s16 }
 0x164   : > { %s1072_s16 = smov %s1074_s18  ;;  %19 = sbr.rel (!%p17_p11) target bundleno = 7 (0x7), region = 87 }
 0x16b   :  { %375 = vsyncpa [#allocation3], 1 }
 0x16c   :  { %377 = vsyncpa [#allocation3 + $0x1], 1 }
 0x16d   :  { %378 = vsyncpa [#allocation6], 1 }
 0x16e   :  { %379 = vsyncpa [#allocation4], 1 }
 0x16f   :  { %381 = vsyncpa [#allocation4 + $0x1], 1 }

</bundles_post_ra>
